<compile_context>
chip_gen: v5e
topology: v5e:2x2
jax: 0.10.0
libtpu: 0.0.40
codegen_flags: <defaults>
</compile_context>

<pallas_src>
import functools

import jax
import jax.numpy as jnp
from jax import lax
from jax.experimental import pallas as pl
from jax.experimental.pallas import tpu as pltpu


def _round_up(x, m):
    return (x + m - 1) // m * m


def _vmem_budget_bytes():
    """Per-generation VMEM budget: capacity minus 16 MiB headroom, capped at ~100 MiB
    (v5e/v6e have 128 MiB physical, v7x only 64 MiB per TensorCore)."""
    cap = 64 << 20
    try:
        cap = int(pltpu.get_tpu_info().vmem_capacity_bytes)
    except Exception:
        pass  # unknown runtime -> stay with the conservative 64 MiB assumption
    return int(min(max(cap - (16 << 20), 32 << 20), 100 << 20))


def _derive_p_tile(P, per_tp_bytes, fixed_bytes, budget):
    """Largest spatial tile that fits the VMEM budget next to the fixed buffers.
    Multiple of 128 (lane-dense stores), preferring multiples of 256 (MXU N on v6e/v7x)."""
    p128 = _round_up(P, 128)
    avail = budget - fixed_bytes - (4 << 20)            # headroom for compiler scratch
    tp = max(avail // max(per_tp_bytes, 1), 128)
    tp = min(tp, 2048, p128)
    if tp >= 256:
        tp = (tp // 256) * 256
    else:
        tp = (tp // 128) * 128
    return int(max(tp, 128))


# ----------------------------- Attention kernels -----------------------------
# Global average pooling is done outside (plain jnp.mean, HBM-roofline reduction);
# these tiny kernels only run the 1x1-conv MLP + softmax over K on the pooled (bs, C).

def _att_mlp_hidden_kernel(pooled_ref, w1_ref, w2_ref, att_ref, *, temperature):
    pooled = pooled_ref[...]                                       # (bs, C)
    h = lax.dot_general(pooled, w1_ref[...], (((1,), (1,)), ((), ())),
                        preferred_element_type=jnp.float32)        # (bs, hidden)
    h = jnp.maximum(h, 0.0)                                        # ReLU
    logits = lax.dot_general(h, w2_ref[...], (((1,), (1,)), ((), ())),
                             preferred_element_type=jnp.float32)   # (bs, K)
    logits = logits / float(temperature)
    m = jnp.max(logits, axis=-1, keepdims=True)
    e = jnp.exp(logits - m)
    att_ref[...] = e / jnp.sum(e, axis=-1, keepdims=True)          # softmax over K


def _att_mlp_single_kernel(pooled_ref, w_ref, att_ref, *, temperature):
    # Used when in_planes <= ratio (no hidden layer).
    pooled = pooled_ref[...]
    logits = lax.dot_general(pooled, w_ref[...], (((1,), (1,)), ((), ())),
                             preferred_element_type=jnp.float32)
    logits = logits / float(temperature)
    m = jnp.max(logits, axis=-1, keepdims=True)
    e = jnp.exp(logits - m)
    att_ref[...] = e / jnp.sum(e, axis=-1, keepdims=True)


# ------------------------- Dynamic-conv (tiled) kernels -------------------------

def _dyn_conv_kernel(att_ref, w_ref, b_ref, patches_ref, out_ref, w_sc, b_sc, *, K):
    # att_ref     : (bs*K,)       f32, SMEM (1-D: scalar reads, no 2-D SMEM padding)
    # w_ref       : (K, out, Ck)  bf16, VMEM, constant index_map (single-buffered)
    # b_ref       : (K, out, 1)   f32,  VMEM, constant index_map (single-buffered)
    # patches_ref : (1, Ck, TP)   bf16, VMEM (im2col tile of batch b, p-tile j)
    # out_ref     : (1, out, TP)  bf16, VMEM (lane-dense: TP multiple of 128)
    # w_sc        : (out, Ck)     bf16 scratch — per-sample aggregated weight
    # b_sc        : (out, 1)      f32  scratch — per-sample aggregated bias
    b = pl.program_id(0)
    pj = pl.program_id(1)

    @pl.when(pj == 0)
    def _():
        # softmax_att @ weight.view(K, -1), once per batch element.  Accumulate in f32
        # (v5e VPU has no bf16), store bf16 for the MXU.  NOTE: bf16 experts -> f32 agg
        # -> bf16 store is a knowing double quantization; keep w_sc f32 and cast at the
        # dot if tighter accuracy is ever needed.
        a = [att_ref[b * K + k] for k in range(K)]
        w_agg = a[0] * w_ref[0]                                    # promotes to f32
        bias = a[0] * b_ref[0]                                     # (out, 1) f32
        for k in range(1, K):
            w_agg = w_agg + a[k] * w_ref[k]
            bias = bias + a[k] * b_ref[k]
        w_sc[...] = w_agg.astype(w_sc.dtype)
        b_sc[...] = bias

    # conv-as-im2col matmul for this spatial tile: (out, Ck) @ (Ck, TP) -> (out, TP)
    acc = lax.dot_general(w_sc[...], patches_ref[0],
                          (((1,), (0,)), ((), ())),
                          preferred_element_type=jnp.float32)
    # NOTE: the spatial padding tail of the output contains bias (not zeros); it is
    # sliced off in the wrapper — never consume the padded buffer directly.
    out_ref[0] = (acc + b_sc[...]).astype(out_ref.dtype)


def _dyn_conv_hoisted_kernel(w_ref, b_ref, patches_ref, out_ref):
    # Small-batch path: aggregation hoisted to XLA, so no scratch / pl.when and both grid
    # axes can be "parallel" (p-tiles shard across v7x's two TensorCores).
    # w_ref: (1, out, Ck) bf16   b_ref: (1, out, 1) f32
    acc = lax.dot_general(w_ref[0], patches_ref[0],
                          (((1,), (0,)), ((), ())),
                          preferred_element_type=jnp.float32)
    out_ref[0] = (acc + b_ref[0]).astype(out_ref.dtype)


# --------------------------------- Wrapper ------------------------------------

def init_dynamic_conv_params(key, in_planes, out_planes, kernel_size, *,
                             K=4, ratio=4, groups=1, bias=True):
    k0, k1, k2, k3 = jax.random.split(key, 4)
    fan_in = (in_planes // groups) * kernel_size * kernel_size
    bound = (6.0 / fan_in) ** 0.5                                  # kaiming_uniform-ish
    params = {
        "weight": jax.random.uniform(
            k0, (K, out_planes, in_planes // groups, kernel_size, kernel_size),
            jnp.float32, -bound, bound),
    }
    if bias:
        params["bias"] = jax.random.normal(k1, (K, out_planes), jnp.float32)
    if in_planes > ratio:
        hidden = in_planes // ratio
        params["att_w1"] = ((2.0 / hidden) ** 0.5) * jax.random.normal(
            k2, (hidden, in_planes), jnp.float32)                  # kaiming_normal fan_out
        params["att_w2"] = ((2.0 / K) ** 0.5) * jax.random.normal(
            k3, (K, hidden), jnp.float32)
    else:
        params["att_w"] = ((2.0 / K) ** 0.5) * jax.random.normal(
            k2, (K, in_planes), jnp.float32)
    return params


def dynamic_conv_forward(params, x, *, kernel_size, stride, padding=0, dilation=1,
                         groups=1, K=4, temperature=30, out_planes=None,
                         aggregate_in_kernel=None):
    assert groups == 1  # TODO(synk): grouped/depthwise (groups > 1) dynamic conv not implemented in the Pallas path
    bs, C, H, W = x.shape
    if out_planes is None:
        out_planes = params["weight"].shape[1]

    # ---- attention: avg-pool (plain JAX) + tiny MLP/softmax Pallas kernel ----
    pooled = jnp.mean(x.astype(jnp.float32), axis=(2, 3))          # (bs, C) == AdaptiveAvgPool2d(1)
    if "att_w1" in params:
        att = pl.pallas_call(
            functools.partial(_att_mlp_hidden_kernel, temperature=temperature),
            out_shape=jax.ShapeDtypeStruct((bs, K), jnp.float32),
        )(pooled, params["att_w1"].astype(jnp.float32),
          params["att_w2"].astype(jnp.float32))
    else:
        att = pl.pallas_call(
            functools.partial(_att_mlp_single_kernel, temperature=temperature),
            out_shape=jax.ShapeDtypeStruct((bs, K), jnp.float32),
        )(pooled, params["att_w"].astype(jnp.float32))

    # ---- im2col in bf16, (bs, Ck, P) layout (channel-major, then kh, kw) ----
    # Casting BEFORE pad/stack halves the HBM read+write traffic of this whole stage.
    # TODO(synk): implicit-GEMM (in-kernel loop over kh*kw taps on shifted x slices) would
    # avoid materializing this kh*kw-inflated patch tensor in HBM entirely.
    kh = kw = kernel_size
    s, d, p = stride, dilation, padding
    OH = (H + 2 * p - d * (kh - 1) - 1) // s + 1
    OW = (W + 2 * p - d * (kw - 1) - 1) // s + 1
    P = OH * OW
    Ck = C * kh * kw
    xb = x.astype(jnp.bfloat16)
    xp = jnp.pad(xb, ((0, 0), (0, 0), (p, p), (p, p)))
    cols = []
    for ih in range(kh):
        for iw in range(kw):
            cols.append(xp[:, :,
                           ih * d: ih * d + (OH - 1) * s + 1: s,
                           iw * d: iw * d + (OW - 1) * s + 1: s])
    patches = jnp.stack(cols, axis=2).reshape(bs, Ck, P)           # (bs, Ck, P) bf16, no transpose

    # ---- path selection + per-generation tile/VMEM sizing ----
    if aggregate_in_kernel is None:
        # Hoist the aggregation for small batch (keeps both v7x cores busy via a fully
        # parallel grid); keep it in-kernel for large batch (avoids bs*out*Ck HBM traffic).
        aggregate_in_kernel = bs >= 8
    deep_patch = out_planes <= 64            # skinny output -> DMA-exposed -> deeper pipeline
    n_patch_buf = 3 if deep_patch else 2

    budget = _vmem_budget_bytes()
    if aggregate_in_kernel:
        fixed = (K * out_planes * Ck * 2 + K * out_planes * 4      # single-buffered const banks
                 + out_planes * Ck * 2 + out_planes * 4)           # scratch
    else:
        fixed = 2 * (out_planes * Ck * 2 + out_planes * 4)         # per-b aggregated blocks (2 bufs)
    per_tp = n_patch_buf * Ck * 2 + 2 * out_planes * 2             # patches bf16 + output bf16 bufs
    TP = _derive_p_tile(P, per_tp, fixed, budget)
    P_pad = _round_up(P, TP)
    if P_pad != P:
        patches = jnp.pad(patches, ((0, 0), (0, 0), (0, P_pad - P)))
    n_pt = P_pad // TP

    bias_arr = params.get("bias", None)
    if bias_arr is None:
        bias_arr = jnp.zeros((K, out_planes), jnp.float32)
    bias_arr = bias_arr.astype(jnp.float32)

    cost = pl.CostEstimate(
        flops=2 * bs * P_pad * Ck * out_planes + 2 * bs * K * out_planes * Ck,
        transcendentals=0,
        bytes_accessed=(bs * Ck * P_pad * 2 + K * out_planes * Ck * 2
                        + K * out_planes * 4 + bs * out_planes * P_pad * 2 + bs * K * 4))
    out_shape = jax.ShapeDtypeStruct((bs, out_planes, P_pad), jnp.bfloat16)

    if aggregate_in_kernel:
        w3 = params["weight"].reshape(K, out_planes, Ck).astype(jnp.bfloat16)
        bias3 = bias_arr.reshape(K, out_planes, 1)
        att_flat = att.reshape(bs * K)       # 1-D SMEM: avoids 2-D SMEM padding blowup

        def run(use_pipeline_modes):
            const_kw = dict(pipeline_mode=pl.Buffered(1)) if use_pipeline_modes else {}
            patch_kw = (dict(pipeline_mode=pl.Buffered(3))
                        if (use_pipeline_modes and deep_patch) else {})
            return pl.pallas_call(
                functools.partial(_dyn_conv_kernel, K=K),
                grid=(bs, n_pt),
                in_specs=[
                    pl.BlockSpec(memory_space=pltpu.MemorySpace.SMEM),            # att (bs*K,)
                    pl.BlockSpec((K, out_planes, Ck), lambda b, j: (0, 0, 0), **const_kw),
                    pl.BlockSpec((K, out_planes, 1), lambda b, j: (0, 0, 0), **const_kw),
                    pl.BlockSpec((1, Ck, TP), lambda b, j: (b, 0, j), **patch_kw),
                ],
                out_specs=pl.BlockSpec((1, out_planes, TP), lambda b, j: (b, 0, j)),
                out_shape=out_shape,
                scratch_shapes=[pltpu.VMEM((out_planes, Ck), jnp.bfloat16),
                                pltpu.VMEM((out_planes, 1), jnp.float32)],
                compiler_params=pltpu.CompilerParams(
                    dimension_semantics=("parallel", "arbitrary"),
                    vmem_limit_bytes=budget),
                cost_estimate=cost,
            )(att_flat, w3, bias3, patches)

        try:
            out = run(True)
        except Exception:
            # Runtime without pipeline_mode / Buffered(1) support: default buffering.
            out = run(False)
    else:
        # Hoisted aggregation (tiny bs*out*Ck einsum in XLA), fully parallel grid.
        w_agg = jnp.einsum(
            "bk,koc->boc", att,
            params["weight"].reshape(K, out_planes, Ck).astype(jnp.float32)
        ).astype(jnp.bfloat16)                                      # (bs, out, Ck)
        b_agg = (att @ bias_arr).reshape(bs, out_planes, 1)         # (bs, out, 1) f32

        def run(use_pipeline_modes):
            patch_kw = (dict(pipeline_mode=pl.Buffered(3))
                        if (use_pipeline_modes and deep_patch) else {})
            return pl.pallas_call(
                _dyn_conv_hoisted_kernel,
                grid=(bs, n_pt),
                in_specs=[
                    pl.BlockSpec((1, out_planes, Ck), lambda b, j: (b, 0, 0)),
                    pl.BlockSpec((1, out_planes, 1), lambda b, j: (b, 0, 0)),
                    pl.BlockSpec((1, Ck, TP), lambda b, j: (b, 0, j), **patch_kw),
                ],
                out_specs=pl.BlockSpec((1, out_planes, TP), lambda b, j: (b, 0, j)),
                out_shape=out_shape,
                compiler_params=pltpu.CompilerParams(
                    dimension_semantics=("parallel", "parallel"),
                    vmem_limit_bytes=budget),
                cost_estimate=cost,
            )(w_agg, b_agg, patches)

        try:
            out = run(True)
        except Exception:
            out = run(False)

    # (bs, out, P_pad) -> drop spatial padding (tail holds bias) -> NCHW, no HBM transpose.
    out = out[:, :, :P].reshape(bs, out_planes, OH, OW)
    return out


# --------------------------- pure-JAX reference --------------------------------

def _reference(params, x, *, kernel_size, stride, padding, dilation, K, temperature, out_planes):
    bs = x.shape[0]
    pooled = jnp.mean(x, axis=(2, 3))
    if "att_w1" in params:
        h = jnp.maximum(pooled @ params["att_w1"].T, 0.0)
        logits = h @ params["att_w2"].T
    else:
        logits = pooled @ params["att_w"].T
    att = jax.nn.softmax(logits / temperature, axis=-1)
    w = jnp.einsum("bk,koihw->boihw", att, params["weight"])
    bias = att @ params["bias"] if "bias" in params else None
    outs = []
    for b in range(bs):
        o = lax.conv_general_dilated(
            x[b:b + 1], w[b], window_strides=(stride, stride),
            padding=[(padding, padding)] * 2, rhs_dilation=(dilation, dilation),
            dimension_numbers=("NCHW", "OIHW", "NCHW"))
        if bias is not None:
            o = o + bias[b][None, :, None, None]
        outs.append(o)
    return jnp.concatenate(outs, axis=0)


if __name__ == "__main__":
    bs, in_planes, out_planes = 2, 8, 8
    H = W = 16
    kernel_size, stride, padding, dilation = 3, 1, 1, 1
    K, ratio, temperature = 4, 4, 30

    root = jax.random.PRNGKey(0)
    kp, kx = jax.random.split(root)
    params = init_dynamic_conv_params(kp, in_planes, out_planes, kernel_size,
                                      K=K, ratio=ratio, bias=True)
    x = jax.random.normal(kx, (bs, in_planes, H, W), jnp.float32)

    ref = _reference(params, x, kernel_size=kernel_size, stride=stride,
                     padding=padding, dilation=dilation, K=K,
                     temperature=temperature, out_planes=out_planes)

    # Exercise both conv paths: hoisted aggregation (small-batch) and in-kernel aggregation.
    for agg_in_kernel in (False, True):
        out = dynamic_conv_forward(params, x, kernel_size=kernel_size, stride=stride,
                                   padding=padding, dilation=dilation, groups=1,
                                   K=K, temperature=temperature, out_planes=out_planes,
                                   aggregate_in_kernel=agg_in_kernel)
        out = jax.block_until_ready(out)
        assert out.shape == (bs, out_planes, H, W)
        outf = out.astype(jnp.float32)
        # bf16 matmul operands + bf16 output with f32 accumulation -> loosened tolerance.
        err = float(jnp.max(jnp.abs(outf - ref)))
        assert jnp.allclose(outf, ref, atol=8e-2, rtol=8e-2), (agg_in_kernel, err)

    print("KERNEL_OK")
</pallas_src>

<mosaic_0001>
module attributes {stable_mosaic.version = 11 : i64} {
  func.func @_att_mlp_hidden_kernel(%arg0: memref<2x8xf32, #tpu.memory_space<vmem>>, %arg1: memref<2x8xf32, #tpu.memory_space<vmem>>, %arg2: memref<4x2xf32, #tpu.memory_space<vmem>>, %arg3: memref<2x4xf32, #tpu.memory_space<vmem>>) attributes {dimension_semantics = [], scalar_prefetch = 0 : i64, scratch_operands = 0 : i64, tpu.core_type = #tpu.core_type<tc>} {
    %c0 = arith.constant 0 : index
    %c0_0 = arith.constant 0 : index
    %0 = vector.load %arg0[%c0, %c0_0] : memref<2x8xf32, #tpu.memory_space<vmem>>, vector<2x8xf32>
    %c0_1 = arith.constant 0 : index
    %c0_2 = arith.constant 0 : index
    %1 = vector.load %arg1[%c0_1, %c0_2] : memref<2x8xf32, #tpu.memory_space<vmem>>, vector<2x8xf32>
    %cst = arith.constant dense<0.000000e+00> : vector<2x2xf32>
    %2 = tpu.matmul %0, %1, %cst {dimension_numbers = #tpu.dot_dimension_numbers<[1], [1], [0], [0], [0, 0, 1, 0], [], []>} : vector<2x8xf32>, vector<2x8xf32>, vector<2x2xf32> -> vector<2x2xf32>
    %cst_3 = arith.constant 0.000000e+00 : f32
    %3 = vector.broadcast %cst_3 : f32 to vector<2x2xf32>
    %4 = arith.maximumf %2, %3 : vector<2x2xf32>
    %c0_4 = arith.constant 0 : index
    %c0_5 = arith.constant 0 : index
    %5 = vector.load %arg2[%c0_4, %c0_5] : memref<4x2xf32, #tpu.memory_space<vmem>>, vector<4x2xf32>
    %cst_6 = arith.constant dense<0.000000e+00> : vector<2x4xf32>
    %6 = tpu.matmul %4, %5, %cst_6 {dimension_numbers = #tpu.dot_dimension_numbers<[1], [1], [0], [0], [0, 0, 1, 0], [], []>} : vector<2x2xf32>, vector<4x2xf32>, vector<2x4xf32> -> vector<2x4xf32>
    %cst_7 = arith.constant 3.000000e+01 : f32
    %7 = vector.broadcast %cst_7 : f32 to vector<2x4xf32>
    %8 = arith.divf %6, %7 : vector<2x4xf32>
    %cst_8 = arith.constant dense<0xFF800000> : vector<2xf32>
    %9 = vector.multi_reduction <maximumf>, %8, %cst_8 [1] : vector<2x4xf32> to vector<2xf32>
    %10 = vector.shape_cast %9 : vector<2xf32> to vector<2x1xf32>
    %11 = vector.broadcast %10 : vector<2x1xf32> to vector<2x4xf32>
    %12 = arith.subf %8, %11 : vector<2x4xf32>
    %13 = math.exp %12 : vector<2x4xf32>
    %cst_9 = arith.constant dense<0.000000e+00> : vector<2xf32>
    %14 = vector.multi_reduction <add>, %13, %cst_9 [1] : vector<2x4xf32> to vector<2xf32>
    %15 = vector.shape_cast %14 : vector<2xf32> to vector<2x1xf32>
    %16 = vector.broadcast %15 : vector<2x1xf32> to vector<2x4xf32>
    %17 = arith.divf %13, %16 : vector<2x4xf32>
    %c0_10 = arith.constant 0 : index
    %c0_11 = arith.constant 0 : index
    %18 = vector.load %arg3[%c0_10, %c0_11] : memref<2x4xf32, #tpu.memory_space<vmem>>, vector<2x4xf32>
    tpu.vector_store %arg3[%c0_10, %c0_11], %17 {strides = array<i32>} : memref<2x4xf32, #tpu.memory_space<vmem>>, vector<2x4xf32>,
    return
  }
}

</mosaic_0001>

<bundles_post_ra>
// kernel: tpu_custom_call.1
= control target key start
LH: loop header
LB: loop body
LE: loop exit
PB: predicated region body
PF: predicated region fallthrough
CT: control target
= control target key end

     0   :  { %vm17_vm0 = vcmask 64512   ;;  %s198_s0 = inlined_call_operand.vmem [shape: f32[2,8], index: 0, kind: input, shape index: {}]   ;;  %s199_s1 = inlined_call_operand.vmem [shape: f32[2,8], index: 1, kind: input, shape index: {}]   ;;  %s200_s2 = inlined_call_operand.vmem [shape: f32[4,2], index: 2, kind: input, shape index: {}]   ;;  %s201_s3 = inlined_call_operand.hbm [shape: f32[2,4], index: 3, kind: output, shape index: {}]  }
   0x1   :  { %v16_v0 = vld [vmem:[%s199_s1] sm:$0x3] }
   0x2   :  { %123 = vmatpush.xpose.msk.msra.mxu0 %vm17_vm0, %v16_v0  ;;  %v15_v1 = vld [vmem:[%s198_s0] sm:$0x3] }
   0x3   :  { %8 = vsyncpa [#allocation3], 0  ;;  %v45_v2 = vld [vmem:[%s200_s2] sm:$0xf]  ;;  %vm46_vm1 = vcmask 15360   ;;  %v161_v5 = vmov 30.0  }
   0x4   :  { %125 = vmatpush.xpose.msk.msra.mxu1 %vm46_vm1, %v45_v2  ;;  %129 = vrcp.f32 %v161_v5  ;;  %vm81_vm3 = vcmask 25600   ;;  %s162_s0 = smov [#allocation2]   ;;  %s114_s19 = sshll.u32 %s201_s3, 4  ;;  %s115_s19 = int_to_ptr.hbm [resolvable:$true] %s114_s19 }
   0x5   :  { %124 = vmatmul.msk.f32.vlgmr.msra.gmra.mxu0 %vm17_vm0, %v15_v1  ;;  %s112_s1 = sshll.u32 %s162_s0, 4  ;;  %s113_s1 = int_to_ptr.vmem [resolvable:$true] %s112_s1 }
   0xa   :  { %v130_v6 = vpop.eup %129 }
   0xb   :  { %v74_v7 = vmul.f32 30.0, %v130_v6  ;;  %vm78_vm2 = vweird.f32 %v130_v6 }
   0xd   :  { %v75_v8 = vsub.f32 1.0, %v74_v7 }
   0xf   :  { %v76_v9 = vmul.f32 %v130_v6, %v75_v8 }
  0x11   :  { %v77_v10 = vadd.f32 %v130_v6, %v76_v9 }
  0x13   :  { %v79_v11 = vsel %vm78_vm2, %v130_v6, %v77_v10 }
  0x82   :  { %v41_v3 = vpop.f32.mrf.mxu0 }
  0x83   :  { %v44_v4 = vmax.f32 %v41_v3, 0.0 }
  0x85   :  { %126 = vmatmul.msk.f32.vlgmr.msra.gmra.mxu1 %vm46_vm1, %v44_v4 }
 0x102   :  { %v70_v12 = vpop.f32.mrf.mxu1 }
 0x103   :  { %v80_v13 = vmul.f32 %v79_v11, %v70_v12 }
 0x105   :  { %v82_v14 = vsel %vm81_vm3, %v80_v13, -inf }
 0x106   :  { %83 = vmax.xlane.f32.xlu0 %v82_v14 }
 0x179   :  { %v84_v15 = vpop.xlane.xlu0 %83 }
 0x17a   :  { %v85_v16 = vsub.f32 %v80_v13, %v84_v15 }
 0x17c   :  { %v86_v17 = vmul.f32 1.442695, %v85_v16 }
 0x17e   :  { %131 = vpow2.f32 %v86_v17 }
 0x184   :  { %v132_v18 = vpop.eup %131 }
 0x185   :  { %v88_v19 = vsel %vm81_vm3, %v132_v18, 0.0 }
 0x186   :  { %89 = vadd.xlane.f32.xlu0 %v88_v19 }
 0x1f9   :  { %v90_v20 = vpop.xlane.xlu0 %89 }
 0x1fa   :  { %133 = vrcp.f32 %v90_v20  ;;  %v102_v24 = vand.u32 2147483648, %v90_v20  ;;  %v100_v26 = vand.u32 2147483647, %v90_v20  ;;  %vm96_vm5 = vweird.f32 %v90_v20 }
 0x1fc   :  { %v103_v28 = vor.u32 1.1754944e-38, %v102_v24  ;;  %vm101_vm7 = vcmp.eq.f32.partialorder %v100_v26, 8.507059e+37 }
 0x200   :  { %v134_v21 = vpop.eup %133 }
 0x201   :  { %v92_v22 = vmul.f32 %v134_v21, %v90_v20  ;;  %vm97_vm4 = vweird.f32 %v134_v21 }
 0x202   :  { %vm98_vm6 = vmor %vm96_vm5, %vm97_vm4 }
 0x203   :  { %v93_v23 = vsub.f32 1.0, %v92_v22 }
 0x205   :  { %v94_v25 = vmul.f32 %v134_v21, %v93_v23 }
 0x207   :  { %v95_v27 = vadd.f32 %v134_v21, %v94_v25 }
 0x209   :  { %v99_v29 = vsel %vm98_vm6, %v134_v21, %v95_v27 }
 0x20a   :  { %v104_v30 = vsel %vm101_vm7, %v103_v28, %v99_v29 }
 0x20b   :  { %v105_v31 = vmul.f32 %v132_v18, %v104_v30 }
 0x20d   :  { %106 = vst.msk [vmem:[#allocation2] sm:$0x3] %vm81_vm3, %v105_v31 }
 0x20e   :  { %117 = dma.vmem_to_hbm [thread:$0]  %s113_s1, 32, %s115_s19, [#allocation3]  }
 0x20f   :  { %159 = dma.done.wait [#allocation3], 32  }
 0x210   :  { %160 = vsyncadd [#allocation3], 4294967264 }
 0x211   :  { %122 = vsyncpa [#allocation3], 1 }

</bundles_post_ra>
